<compile_context>
chip_gen: v7x
topology: tpu7x:2x2x1
jax: 0.10.0
libtpu: 0.0.40
codegen_flags: <defaults>
</compile_context>

<pallas_src>
import functools

import jax
import jax.numpy as jnp
from jax.experimental import pallas as pl
from jax.experimental.pallas import tpu as pltpu


def _concat_dma_kernel(offsets_and_sizes, *refs):
    """refs = (*in_hbm_refs, out_hbm_ref, dma_sems).

    Each in_hbm_ref has shape (B, F_i); out_hbm_ref has shape (B, sum F_i).
    Pure DMA: start one HBM->HBM copy per input into its static lane slice of
    the output, then wait on all of them.  No VMEM, no vector loads/stores.
    """
    *in_refs, out_ref, sems = refs
    copies = []
    for idx, ((off, size), in_ref) in enumerate(zip(offsets_and_sizes, in_refs)):
        cp = pltpu.make_async_copy(
            in_ref,                              # full (B, F_i) HBM source
            out_ref.at[:, off:off + size],       # static lane-offset HBM slice
            sems.at[idx],
        )
        cp.start()
        copies.append(cp)
    # All copies proceed concurrently on the DMA engines; block until done.
    for cp in copies:
        cp.wait()


def concat_dim1(xs):
    """Pallas equivalent of torch.cat(xs, dim=1) for a list of NCHW arrays."""
    assert len(xs) >= 1
    B, _, H, W = xs[0].shape
    dtype = xs[0].dtype
    for x in xs:
        assert x.shape[0] == B and x.shape[2] == H and x.shape[3] == W
        assert x.dtype == dtype

    flat_sizes = [x.shape[1] * H * W for x in xs]
    offsets = []
    off = 0
    for s in flat_sizes:
        offsets.append((off, s))
        off += s
    total = off
    c_total = sum(x.shape[1] for x in xs)

    # Free reshape for contiguous NCHW inputs.
    xs_flat = [x.reshape(B, -1) for x in xs]

    kernel = functools.partial(_concat_dma_kernel, tuple(offsets))
    itemsize = jnp.dtype(dtype).itemsize

    out_flat = pl.pallas_call(
        kernel,
        out_shape=jax.ShapeDtypeStruct((B, total), dtype),
        # Everything stays in HBM; the kernel only drives DMA engines.
        in_specs=[pl.BlockSpec(memory_space=pl.ANY) for _ in xs_flat],
        out_specs=pl.BlockSpec(memory_space=pl.ANY),
        scratch_shapes=[pltpu.SemaphoreType.DMA((len(xs_flat),))],
        # Advise XLA this is a pure memory op: read all inputs + write output.
        cost_estimate=pl.CostEstimate(
            flops=0,
            transcendentals=0,
            bytes_accessed=2 * B * total * itemsize,
        ),
    )(*xs_flat)

    return out_flat.reshape(B, c_total, H, W)


if __name__ == "__main__":
    key = jax.random.PRNGKey(0)
    k1, k2, k3 = jax.random.split(key, 3)

    # Small NCHW inputs consistent with the forward (a list of tensors to cat
    # on dim=1).  Flattened per-input sizes (C_i*H*W = 1024/2048/1024) keep the
    # channel offsets 128-lane aligned, so the DMAs are tile-aligned.
    B, H, W = 2, 16, 16
    x1 = jax.random.normal(k1, (B, 4, H, W), dtype=jnp.float32)
    x2 = jax.random.normal(k2, (B, 8, H, W), dtype=jnp.float32)
    x3 = jax.random.normal(k3, (B, 4, H, W), dtype=jnp.float32)

    out = concat_dim1([x1, x2, x3])
    out = jax.block_until_ready(out)

    ref = jnp.concatenate([x1, x2, x3], axis=1)
    assert out.shape == (B, 16, H, W), out.shape
    assert jnp.array_equal(out, ref), "mismatch vs jnp.concatenate reference"

    print("KERNEL_OK")
</pallas_src>

<mosaic_0001>
module attributes {stable_mosaic.version = 11 : i64} {
  func.func @_concat_dma_kernel(%arg0: memref<2x1024xf32, #tpu.memory_space<any>>, %arg1: memref<2x2048xf32, #tpu.memory_space<any>>, %arg2: memref<2x1024xf32, #tpu.memory_space<any>>, %arg3: memref<2x4096xf32, #tpu.memory_space<any>>, %arg4: memref<3x!tpu.dma_semaphore, #tpu.memory_space<semaphore_mem>>) attributes {dimension_semantics = [], scalar_prefetch = 0 : i64, scratch_operands = 1 : i64, tpu.core_type = #tpu.core_type<tc>} {
    %c0_i32 = arith.constant 0 : i32
    %c0_i32_0 = arith.constant 0 : i32
    %c0_i32_1 = arith.constant 0 : i32
    %0 = tpu.memref_slice %arg3[%c0_i32_0, %c0_i32_1] : memref<2x4096xf32, #tpu.memory_space<any>> -> memref<2x1024xf32, #tpu.memory_space<any>>
    %1 = tpu.memref_slice %arg4[%c0_i32] : memref<3x!tpu.dma_semaphore, #tpu.memory_space<semaphore_mem>> -> memref<1x!tpu.dma_semaphore, #tpu.memory_space<semaphore_mem>>
    %2 = tpu.memref_squeeze %1 : memref<1x!tpu.dma_semaphore, #tpu.memory_space<semaphore_mem>> -> memref<!tpu.dma_semaphore, #tpu.memory_space<semaphore_mem>>
    tpu.enqueue_dma source(%arg0 : memref<2x1024xf32, #tpu.memory_space<any>>) target(%0 : memref<2x1024xf32, #tpu.memory_space<any>>) target_semaphore(%2 : memref<!tpu.dma_semaphore, #tpu.memory_space<semaphore_mem>>)
    %c1_i32 = arith.constant 1 : i32
    %c0_i32_2 = arith.constant 0 : i32
    %c1024_i32 = arith.constant 1024 : i32
    %3 = tpu.memref_slice %arg3[%c0_i32_2, %c1024_i32] : memref<2x4096xf32, #tpu.memory_space<any>> -> memref<2x2048xf32, #tpu.memory_space<any>>
    %4 = tpu.memref_slice %arg4[%c1_i32] : memref<3x!tpu.dma_semaphore, #tpu.memory_space<semaphore_mem>> -> memref<1x!tpu.dma_semaphore, #tpu.memory_space<semaphore_mem>>
    %5 = tpu.memref_squeeze %4 : memref<1x!tpu.dma_semaphore, #tpu.memory_space<semaphore_mem>> -> memref<!tpu.dma_semaphore, #tpu.memory_space<semaphore_mem>>
    tpu.enqueue_dma source(%arg1 : memref<2x2048xf32, #tpu.memory_space<any>>) target(%3 : memref<2x2048xf32, #tpu.memory_space<any>>) target_semaphore(%5 : memref<!tpu.dma_semaphore, #tpu.memory_space<semaphore_mem>>)
    %c2_i32 = arith.constant 2 : i32
    %c0_i32_3 = arith.constant 0 : i32
    %c3072_i32 = arith.constant 3072 : i32
    %6 = tpu.memref_slice %arg3[%c0_i32_3, %c3072_i32] : memref<2x4096xf32, #tpu.memory_space<any>> -> memref<2x1024xf32, #tpu.memory_space<any>>
    %7 = tpu.memref_slice %arg4[%c2_i32] : memref<3x!tpu.dma_semaphore, #tpu.memory_space<semaphore_mem>> -> memref<1x!tpu.dma_semaphore, #tpu.memory_space<semaphore_mem>>
    %8 = tpu.memref_squeeze %7 : memref<1x!tpu.dma_semaphore, #tpu.memory_space<semaphore_mem>> -> memref<!tpu.dma_semaphore, #tpu.memory_space<semaphore_mem>>
    tpu.enqueue_dma source(%arg2 : memref<2x1024xf32, #tpu.memory_space<any>>) target(%6 : memref<2x1024xf32, #tpu.memory_space<any>>) target_semaphore(%8 : memref<!tpu.dma_semaphore, #tpu.memory_space<semaphore_mem>>)
    %c0_i32_4 = arith.constant 0 : i32
    %c0_i32_5 = arith.constant 0 : i32
    %c0_i32_6 = arith.constant 0 : i32
    %9 = tpu.memref_slice %arg3[%c0_i32_5, %c0_i32_6] : memref<2x4096xf32, #tpu.memory_space<any>> -> memref<2x1024xf32, #tpu.memory_space<any>>
    %10 = tpu.memref_slice %arg4[%c0_i32_4] : memref<3x!tpu.dma_semaphore, #tpu.memory_space<semaphore_mem>> -> memref<1x!tpu.dma_semaphore, #tpu.memory_space<semaphore_mem>>
    %11 = tpu.memref_squeeze %10 : memref<1x!tpu.dma_semaphore, #tpu.memory_space<semaphore_mem>> -> memref<!tpu.dma_semaphore, #tpu.memory_space<semaphore_mem>>
    tpu.wait_dma2 semaphore(%11 : memref<!tpu.dma_semaphore, #tpu.memory_space<semaphore_mem>>) src(%arg0 : memref<2x1024xf32, #tpu.memory_space<any>>) dst(%9 : memref<2x1024xf32, #tpu.memory_space<any>>)
    %c1_i32_7 = arith.constant 1 : i32
    %c0_i32_8 = arith.constant 0 : i32
    %c1024_i32_9 = arith.constant 1024 : i32
    %12 = tpu.memref_slice %arg3[%c0_i32_8, %c1024_i32_9] : memref<2x4096xf32, #tpu.memory_space<any>> -> memref<2x2048xf32, #tpu.memory_space<any>>
    %13 = tpu.memref_slice %arg4[%c1_i32_7] : memref<3x!tpu.dma_semaphore, #tpu.memory_space<semaphore_mem>> -> memref<1x!tpu.dma_semaphore, #tpu.memory_space<semaphore_mem>>
    %14 = tpu.memref_squeeze %13 : memref<1x!tpu.dma_semaphore, #tpu.memory_space<semaphore_mem>> -> memref<!tpu.dma_semaphore, #tpu.memory_space<semaphore_mem>>
    tpu.wait_dma2 semaphore(%14 : memref<!tpu.dma_semaphore, #tpu.memory_space<semaphore_mem>>) src(%arg1 : memref<2x2048xf32, #tpu.memory_space<any>>) dst(%12 : memref<2x2048xf32, #tpu.memory_space<any>>)
    %c2_i32_10 = arith.constant 2 : i32
    %c0_i32_11 = arith.constant 0 : i32
    %c3072_i32_12 = arith.constant 3072 : i32
    %15 = tpu.memref_slice %arg3[%c0_i32_11, %c3072_i32_12] : memref<2x4096xf32, #tpu.memory_space<any>> -> memref<2x1024xf32, #tpu.memory_space<any>>
    %16 = tpu.memref_slice %arg4[%c2_i32_10] : memref<3x!tpu.dma_semaphore, #tpu.memory_space<semaphore_mem>> -> memref<1x!tpu.dma_semaphore, #tpu.memory_space<semaphore_mem>>
    %17 = tpu.memref_squeeze %16 : memref<1x!tpu.dma_semaphore, #tpu.memory_space<semaphore_mem>> -> memref<!tpu.dma_semaphore, #tpu.memory_space<semaphore_mem>>
    tpu.wait_dma2 semaphore(%17 : memref<!tpu.dma_semaphore, #tpu.memory_space<semaphore_mem>>) src(%arg2 : memref<2x1024xf32, #tpu.memory_space<any>>) dst(%15 : memref<2x1024xf32, #tpu.memory_space<any>>)
    return
  }
}

</mosaic_0001>

<bundles_post_ra>
// kernel: tpu_custom_call.1
= control target key start
LH: loop header
LB: loop body
LE: loop exit
PB: predicated region body
PF: predicated region fallthrough
CT: control target
= control target key end

     0   :  { %s96_s15 = smov [#allocation2]   ;;  %s97_s16 = smov [#allocation3]   ;;  %s141_s0 = inlined_call_operand.hbm [shape: f32[2,1024], index: 0, kind: input, shape index: {}]   ;;  %s142_s3 = inlined_call_operand.hbm [shape: f32[2,4096], index: 3, kind: output, shape index: {}]   ;;  %s143_s1 = inlined_call_operand.hbm [shape: f32[2,2048], index: 1, kind: input, shape index: {}]   ;;  %s144_s2 = inlined_call_operand.hbm [shape: f32[2,1024], index: 2, kind: input, shape index: {}]  }
   0x1   :  { %s21_s14 = scalar_lea.hbm %s142_s3, 256  ;;  %s98_s17 = smov 0  }
   0x2   :  { %20 = dma.general %s141_s0, 256, %s142_s3, %s96_s15, %s97_s16, [#allocation4], %s98_s17, 0  }
   0x3   :  { %s36_s24 = scalar_lea.hbm %s142_s3, 768  ;;  %s99_s25 = smov [#allocation2 + $0x1]  }
   0x4   :  { %s100_s26 = smov [#allocation5]   ;;  %s101_s29 = smov [#allocation2 + $0x2]  }
   0x5   :  { %35 = dma.general %s143_s1, 512, %s21_s14, %s99_s25, %s100_s26, [#allocation6], %s98_s17, 0  }
   0x6   :  { %s102_s30 = smov [#allocation7]  }
   0x7   :  { %50 = dma.general %s144_s2, 256, %s36_s24, %s101_s29, %s102_s30, [#allocation8], %s98_s17, 0  }
   0x8   :  { %90 = dma.done.wait [#allocation2], 256 }
   0x9   :  { %91 = vsyncadd [#allocation2], 4294967040 }
   0xa   :  { %92 = dma.done.wait [#allocation2 + $0x1], 512 }
   0xb   :  { %93 = vsyncadd [#allocation2 + $0x1], 4294966784 }
   0xc   :  { %94 = dma.done.wait [#allocation2 + $0x2], 256 }
   0xd   :  { %95 = vsyncadd [#allocation2 + $0x2], 4294967040 }
   0xe   :  { %60 = vsyncmov [#allocation2] }
  0x11   :  { %s61_s0 = vpop.sfrf %60 }
  0x12   :  { %p80_p0 = scmp.ne.s32.totalorder %s61_s0, 0 }
  0x14   :  { %65 = shalt.err (%p80_p0)  }
  0x15   :  { %67 = vsyncmov [#allocation2 + $0x1] }
  0x18   :  { %s68_s3 = vpop.sfrf %67 }
  0x19   :  { %p81_p1 = scmp.ne.s32.totalorder %s68_s3, 0 }
  0x1b   :  { %72 = shalt.err (%p81_p1)  }
  0x1c   :  { %74 = vsyncmov [#allocation2 + $0x2] }
  0x1f   :  { %s75_s1 = vpop.sfrf %74 }
  0x20   :  { %p82_p2 = scmp.ne.s32.totalorder %s75_s1, 0 }
  0x22   :  { %79 = shalt.err (%p82_p2)  }

</bundles_post_ra>
